<compile_context>
chip_gen: v6e
topology: v6e:2x2x1
jax: 0.10.0
libtpu: 0.0.40
codegen_flags: <defaults>
</compile_context>

<pallas_src>
import functools

import jax
import jax.numpy as jnp
from jax.experimental import pallas as pl
from jax.experimental.pallas import tpu as pltpu

# Module hyper-parameters (DiceLoss.__init__ defaults)
SMOOTH = 1.0
EXPONENT = 2          # kernel assumes the default integer exponent 2:
                      # p**2 -> p*p, and onehot**2 == onehot (values in {0,1})
LOSS_WEIGHT = 1.0
IGNORE_INDEX = 255


def _dice_kernel(pred_ref, tgt_ref, inter_out_ref, den_out_ref,
                 inter_acc, den_acc, *, hw, tile_hw, ignore_index):
    t_idx = pl.program_id(1)

    @pl.when(t_idx == 0)
    def _():
        inter_acc[...] = jnp.zeros_like(inter_acc)
        den_acc[...] = jnp.zeros_like(den_acc)

    x = pred_ref[0].astype(jnp.float32)          # (C, TILE_HW) logits
    labels = tgt_ref[0]                          # (1, TILE_HW) int32
    num_classes = x.shape[0]

    valid = labels != ignore_index               # (1, TILE_HW) bool

    if hw % tile_hw != 0:
        # Tail tile: mask lanes beyond the real spatial extent and neutralize
        # whatever padding Pallas streamed in so exp/softmax stays finite.
        lane = jax.lax.broadcasted_iota(jnp.int32, labels.shape, 1)
        in_range = (t_idx * tile_hw + lane) < hw
        valid = jnp.logical_and(valid, in_range)
        x = jnp.where(in_range, x, 0.0)

    # Row-wise (per-pixel) softmax over the class (sublane) axis; the divide
    # goes to the otherwise-idle EUP via the approximate reciprocal.
    m = jnp.max(x, axis=0, keepdims=True)        # (1, TILE_HW)
    e = jnp.exp(x - m)                           # (C, TILE_HW)
    p = e * pl.reciprocal(jnp.sum(e, axis=0, keepdims=True), approx=True)

    mask = valid.astype(jnp.float32)             # (1, TILE_HW) in {0, 1}
    cls = jax.lax.broadcasted_iota(jnp.int32, x.shape, 0)
    onehot = (cls == jnp.clip(labels, 0, num_classes - 1)).astype(jnp.float32)

    # Masked accumulation.  mask in {0,1}, onehot in {0,1}:
    #   inter += p * onehot * mask
    #   den   += (p^2 + onehot) * mask     (onehot**EXPONENT == onehot)
    p_m = p * mask
    inter_acc[...] += p_m * onehot
    den_acc[...] += p_m * p + onehot * mask

    @pl.when(t_idx == pl.num_programs(1) - 1)
    def _():
        # Single deferred cross-lane (XLU) reduction per image.
        inter_out_ref[...] = jnp.sum(inter_acc[...], axis=1, keepdims=True)[None]
        den_out_ref[...] = jnp.sum(den_acc[...], axis=1, keepdims=True)[None]


def dice_loss_pallas(pred, target, tile_hw=None):
    """pred: (N, C, H, W) float; target: (N, H, W) int labels. Returns scalar."""
    N, C, H, W = pred.shape
    HW = H * W

    # Free, copy-less views: keep NCHW order, fold the spatial dims.
    pred3 = pred.reshape(N, C, HW)                     # (N, C, HW), no transpose
    tgt3 = target.reshape(N, 1, HW).astype(jnp.int32)  # (N, 1, HW)

    itemsize = jnp.dtype(pred.dtype).itemsize
    if tile_hw is None:
        # ~1 MiB of pred per tile, lane-aligned -> well inside every
        # generation's VMEM even with double buffering + accumulators
        # (v5e/v6e 128 MiB, v7x 64 MiB physical).
        tile_hw = max(128, ((1 << 20) // (C * itemsize)) // 128 * 128)
    if tile_hw >= HW:
        tile_hw = HW                        # single full-extent tile (legal block)
    else:
        tile_hw = max(128, (tile_hw // 128) * 128)   # lane-aligned partial tiles
    num_t = pl.cdiv(HW, tile_hw)

    kernel = functools.partial(_dice_kernel, hw=HW, tile_hw=tile_hw,
                               ignore_index=IGNORE_INDEX)

    inter_p, den_p = pl.pallas_call(
        kernel,
        out_shape=(jax.ShapeDtypeStruct((N, C, 1), jnp.float32),
                   jax.ShapeDtypeStruct((N, C, 1), jnp.float32)),
        grid_spec=pltpu.PrefetchScalarGridSpec(
            num_scalar_prefetch=0,
            grid=(N, num_t),
            in_specs=[
                pl.BlockSpec((1, C, tile_hw), lambda n, t: (n, 0, t)),
                pl.BlockSpec((1, 1, tile_hw), lambda n, t: (n, 0, t)),
            ],
            out_specs=[
                pl.BlockSpec((1, C, 1), lambda n, t: (n, 0, 0)),
                pl.BlockSpec((1, C, 1), lambda n, t: (n, 0, 0)),
            ],
            scratch_shapes=[
                pltpu.VMEM((C, tile_hw), jnp.float32),   # per-class intersection
                pltpu.VMEM((C, tile_hw), jnp.float32),   # per-class denominator
            ],
        ),
        compiler_params=pltpu.CompilerParams(
            # batch axis parallel -> both v7x TensorCores stream; spatial-tile
            # axis carries the resident accumulators -> arbitrary.
            dimension_semantics=("parallel", "arbitrary"),
            vmem_limit_bytes=32 * 1024 * 1024,
        ),
    )(pred3, tgt3)

    # Tiny epilogue in plain JAX: combine per-image partials and do the dice math.
    inter = jnp.sum(inter_p[:, :, 0], axis=0)   # (C,)
    den = jnp.sum(den_p[:, :, 0], axis=0)       # (C,)
    dice = 1.0 - (2.0 * inter + SMOOTH) / (den + SMOOTH)
    # Mirror the torch loop's `if i != ignore_index` class skip (no-op for 255
    # when ignore_index >= num_classes), while still dividing by num_classes.
    dice = jnp.where(jnp.arange(C) == IGNORE_INDEX, 0.0, dice)
    return (LOSS_WEIGHT / C) * jnp.sum(dice)


def dice_loss_ref(pred, target):
    """Pure-JAX reference mirroring the PyTorch forward (for verification)."""
    N, C, H, W = pred.shape
    p2 = jnp.transpose(pred, (0, 2, 3, 1)).reshape(-1, C).astype(jnp.float32)
    t = target.reshape(-1)
    valid = (t != IGNORE_INDEX)[:, None].astype(jnp.float32)
    p = jax.nn.softmax(p2, axis=1)
    oh = jax.nn.one_hot(jnp.clip(t, 0, C - 1), C, dtype=jnp.float32)
    inter = jnp.sum(p * oh * valid, axis=0)
    den = jnp.sum((p ** EXPONENT + oh ** EXPONENT) * valid, axis=0)
    dice = 1.0 - (2.0 * inter + SMOOTH) / (den + SMOOTH)
    return LOSS_WEIGHT * jnp.sum(dice) / C


if __name__ == "__main__":
    key = jax.random.PRNGKey(0)
    k_pred, k_tgt, k_ign = jax.random.split(key, 3)

    N, C, H, W = 2, 4, 16, 16
    pred = jax.random.normal(k_pred, (N, C, H, W), dtype=jnp.float32)
    target = jax.random.randint(k_tgt, (N, H, W), 0, C, dtype=jnp.int32)
    # sprinkle in some ignore_index pixels to exercise the valid-mask path
    ignore_mask = jax.random.bernoulli(k_ign, 0.1, (N, H, W))
    target = jnp.where(ignore_mask, IGNORE_INDEX, target)

    loss = dice_loss_pallas(pred, target)
    loss = jax.block_until_ready(loss)

    ref = dice_loss_ref(pred, target)
    # approx reciprocal (EUP) in the softmax denominator -> allow ~1e-3 slack
    assert jnp.allclose(loss, ref, atol=2e-3, rtol=2e-3), (loss, ref)

    print("KERNEL_OK")
</pallas_src>

<mosaic_0001>
module attributes {stable_mosaic.version = 11 : i64} {
  func.func @_dice_kernel(%arg0: i32, %arg1: i32, %arg2: memref<1x4x256xf32, #tpu.memory_space<vmem>>, %arg3: memref<1x1x256xi32, #tpu.memory_space<vmem>>, %arg4: memref<1x4x1xf32, #tpu.memory_space<vmem>>, %arg5: memref<1x4x1xf32, #tpu.memory_space<vmem>>, %arg6: memref<4x256xf32, #tpu.memory_space<vmem>>, %arg7: memref<4x256xf32, #tpu.memory_space<vmem>>) attributes {dimension_semantics = [#tpu.dimension_semantics<parallel>, #tpu.dimension_semantics<arbitrary>], iteration_bounds = array<i64: 2, 1>, scalar_prefetch = 0 : i64, scratch_operands = 2 : i64, tpu.core_type = #tpu.core_type<tc>, window_params = [{transform_indices = @transform_0, window_bounds = array<i64: 1, 4, 256>}, {transform_indices = @transform_1, window_bounds = array<i64: 1, 1, 256>}, {transform_indices = @transform_2, window_bounds = array<i64: 1, 4, 1>}, {transform_indices = @transform_3, window_bounds = array<i64: 1, 4, 1>}]} {
    %c0_i32 = arith.constant 0 : i32
    %0 = arith.cmpi eq, %arg1, %c0_i32 : i32
    %1 = arith.extui %0 : i1 to i32
    %c0_i32_0 = arith.constant 0 : i32
    %2 = arith.cmpi ne, %1, %c0_i32_0 : i32
    scf.if %2 {
      %cst_18 = arith.constant 0.000000e+00 : f32
      %46 = vector.broadcast %cst_18 : f32 to vector<4x256xf32>
      %c0_19 = arith.constant 0 : index
      %c0_20 = arith.constant 0 : index
      %47 = vector.load %arg6[%c0_19, %c0_20] : memref<4x256xf32, #tpu.memory_space<vmem>>, vector<4x256xf32>
      tpu.vector_store %arg6[%c0_19, %c0_20], %46 {strides = array<i32>} : memref<4x256xf32, #tpu.memory_space<vmem>>, vector<4x256xf32>,
      %cst_21 = arith.constant 0.000000e+00 : f32
      %48 = vector.broadcast %cst_21 : f32 to vector<4x256xf32>
      %c0_22 = arith.constant 0 : index
      %c0_23 = arith.constant 0 : index
      %49 = vector.load %arg7[%c0_22, %c0_23] : memref<4x256xf32, #tpu.memory_space<vmem>>, vector<4x256xf32>
      tpu.vector_store %arg7[%c0_22, %c0_23], %48 {strides = array<i32>} : memref<4x256xf32, #tpu.memory_space<vmem>>, vector<4x256xf32>,
    } else {
    }
    %c0 = arith.constant 0 : index
    %c0_1 = arith.constant 0 : index
    %c0_2 = arith.constant 0 : index
    %3 = vector.load %arg2[%c0, %c0_1, %c0_2] : memref<1x4x256xf32, #tpu.memory_space<vmem>>, vector<1x4x256xf32>
    %4 = vector.shape_cast %3 : vector<1x4x256xf32> to vector<4x256xf32>
    %c0_3 = arith.constant 0 : index
    %c0_4 = arith.constant 0 : index
    %c0_5 = arith.constant 0 : index
    %5 = vector.load %arg3[%c0_3, %c0_4, %c0_5] : memref<1x1x256xi32, #tpu.memory_space<vmem>>, vector<1x1x256xi32>
    %6 = vector.shape_cast %5 : vector<1x1x256xi32> to vector<1x256xi32>
    %c255_i32 = arith.constant 255 : i32
    %7 = vector.broadcast %c255_i32 : i32 to vector<1x256xi32>
    %8 = arith.cmpi ne, %6, %7 : vector<1x256xi32>
    %cst = arith.constant dense<0xFF800000> : vector<256xf32>
    %9 = vector.multi_reduction <maximumf>, %4, %cst [0] : vector<4x256xf32> to vector<256xf32>
    %10 = vector.shape_cast %9 : vector<256xf32> to vector<1x256xf32>
    %11 = vector.broadcast %10 : vector<1x256xf32> to vector<4x256xf32>
    %12 = arith.subf %4, %11 : vector<4x256xf32>
    %13 = math.exp %12 : vector<4x256xf32>
    %cst_6 = arith.constant dense<0.000000e+00> : vector<256xf32>
    %14 = vector.multi_reduction <add>, %13, %cst_6 [0] : vector<4x256xf32> to vector<256xf32>
    %15 = vector.shape_cast %14 : vector<256xf32> to vector<1x256xf32>
    %16 = tpu.reciprocal %15 {approx = true} : vector<1x256xf32> -> vector<1x256xf32>
    %17 = vector.broadcast %16 : vector<1x256xf32> to vector<4x256xf32>
    %18 = arith.mulf %13, %17 : vector<4x256xf32>
    %19 = arith.extui %8 : vector<1x256xi1> to vector<1x256xi32>
    %20 = arith.sitofp %19 : vector<1x256xi32> to vector<1x256xf32>
    %21 = tpu.iota {dimensions = array<i32: 0>} : vector<4x256xi32>
    %c0_i32_7 = arith.constant 0 : i32
    %c3_i32 = arith.constant 3 : i32
    %22 = vector.broadcast %c0_i32_7 : i32 to vector<1x256xi32>
    %23 = arith.maxsi %22, %6 : vector<1x256xi32>
    %24 = vector.broadcast %c3_i32 : i32 to vector<1x256xi32>
    %25 = arith.minsi %24, %23 : vector<1x256xi32>
    %26 = vector.broadcast %25 : vector<1x256xi32> to vector<4x256xi32>
    %27 = arith.cmpi eq, %21, %26 : vector<4x256xi32>
    %28 = arith.extui %27 : vector<4x256xi1> to vector<4x256xi32>
    %29 = arith.sitofp %28 : vector<4x256xi32> to vector<4x256xf32>
    %30 = vector.broadcast %20 : vector<1x256xf32> to vector<4x256xf32>
    %31 = arith.mulf %18, %30 : vector<4x256xf32>
    %c0_8 = arith.constant 0 : index
    %c0_9 = arith.constant 0 : index
    %32 = vector.load %arg6[%c0_8, %c0_9] : memref<4x256xf32, #tpu.memory_space<vmem>>, vector<4x256xf32>
    %33 = arith.mulf %31, %29 : vector<4x256xf32>
    %34 = arith.addf %32, %33 : vector<4x256xf32>
    %c0_10 = arith.constant 0 : index
    %c0_11 = arith.constant 0 : index
    %35 = vector.load %arg6[%c0_10, %c0_11] : memref<4x256xf32, #tpu.memory_space<vmem>>, vector<4x256xf32>
    tpu.vector_store %arg6[%c0_10, %c0_11], %34 {strides = array<i32>} : memref<4x256xf32, #tpu.memory_space<vmem>>, vector<4x256xf32>,
    %c0_12 = arith.constant 0 : index
    %c0_13 = arith.constant 0 : index
    %36 = vector.load %arg7[%c0_12, %c0_13] : memref<4x256xf32, #tpu.memory_space<vmem>>, vector<4x256xf32>
    %37 = arith.mulf %31, %18 : vector<4x256xf32>
    %38 = vector.broadcast %20 : vector<1x256xf32> to vector<4x256xf32>
    %39 = arith.mulf %29, %38 : vector<4x256xf32>
    %40 = arith.addf %37, %39 : vector<4x256xf32>
    %41 = arith.addf %36, %40 : vector<4x256xf32>
    %c0_14 = arith.constant 0 : index
    %c0_15 = arith.constant 0 : index
    %42 = vector.load %arg7[%c0_14, %c0_15] : memref<4x256xf32, #tpu.memory_space<vmem>>, vector<4x256xf32>
    tpu.vector_store %arg7[%c0_14, %c0_15], %41 {strides = array<i32>} : memref<4x256xf32, #tpu.memory_space<vmem>>, vector<4x256xf32>,
    %c0_i32_16 = arith.constant 0 : i32
    %43 = arith.cmpi eq, %arg1, %c0_i32_16 : i32
    %44 = arith.extui %43 : i1 to i32
    %c0_i32_17 = arith.constant 0 : i32
    %45 = arith.cmpi ne, %44, %c0_i32_17 : i32
    scf.if %45 {
      %c0_18 = arith.constant 0 : index
      %c0_19 = arith.constant 0 : index
      %46 = vector.load %arg6[%c0_18, %c0_19] : memref<4x256xf32, #tpu.memory_space<vmem>>, vector<4x256xf32>
      %cst_20 = arith.constant dense<0.000000e+00> : vector<4xf32>
      %47 = vector.multi_reduction <add>, %46, %cst_20 [1] : vector<4x256xf32> to vector<4xf32>
      %48 = vector.shape_cast %47 : vector<4xf32> to vector<4x1xf32>
      %49 = vector.shape_cast %48 : vector<4x1xf32> to vector<1x4x1xf32>
      %c0_21 = arith.constant 0 : index
      %c0_22 = arith.constant 0 : index
      %c0_23 = arith.constant 0 : index
      %50 = vector.load %arg4[%c0_21, %c0_22, %c0_23] : memref<1x4x1xf32, #tpu.memory_space<vmem>>, vector<1x4x1xf32>
      tpu.vector_store %arg4[%c0_21, %c0_22, %c0_23], %49 {strides = array<i32>} : memref<1x4x1xf32, #tpu.memory_space<vmem>>, vector<1x4x1xf32>,
      %c0_24 = arith.constant 0 : index
      %c0_25 = arith.constant 0 : index
      %51 = vector.load %arg7[%c0_24, %c0_25] : memref<4x256xf32, #tpu.memory_space<vmem>>, vector<4x256xf32>
      %cst_26 = arith.constant dense<0.000000e+00> : vector<4xf32>
      %52 = vector.multi_reduction <add>, %51, %cst_26 [1] : vector<4x256xf32> to vector<4xf32>
      %53 = vector.shape_cast %52 : vector<4xf32> to vector<4x1xf32>
      %54 = vector.shape_cast %53 : vector<4x1xf32> to vector<1x4x1xf32>
      %c0_27 = arith.constant 0 : index
      %c0_28 = arith.constant 0 : index
      %c0_29 = arith.constant 0 : index
      %55 = vector.load %arg5[%c0_27, %c0_28, %c0_29] : memref<1x4x1xf32, #tpu.memory_space<vmem>>, vector<1x4x1xf32>
      tpu.vector_store %arg5[%c0_27, %c0_28, %c0_29], %54 {strides = array<i32>} : memref<1x4x1xf32, #tpu.memory_space<vmem>>, vector<1x4x1xf32>,
    } else {
    }
    return
  }
  func.func @transform_0(%arg0: i32, %arg1: i32) -> (i32, i32, i32) {
    %c0_i32 = arith.constant 0 : i32
    %c0_i32_0 = arith.constant 0 : i32
    return %arg0, %c0_i32, %arg1 : i32, i32, i32
  }
  func.func @transform_1(%arg0: i32, %arg1: i32) -> (i32, i32, i32) {
    %c0_i32 = arith.constant 0 : i32
    %c0_i32_0 = arith.constant 0 : i32
    return %arg0, %c0_i32, %arg1 : i32, i32, i32
  }
  func.func @transform_2(%arg0: i32, %arg1: i32) -> (i32, i32, i32) {
    %c0_i32 = arith.constant 0 : i32
    %c0_i32_0 = arith.constant 0 : i32
    %c0_i32_1 = arith.constant 0 : i32
    return %arg0, %c0_i32, %c0_i32_0 : i32, i32, i32
  }
  func.func @transform_3(%arg0: i32, %arg1: i32) -> (i32, i32, i32) {
    %c0_i32 = arith.constant 0 : i32
    %c0_i32_0 = arith.constant 0 : i32
    %c0_i32_1 = arith.constant 0 : i32
    return %arg0, %c0_i32, %c0_i32_0 : i32, i32, i32
  }
}

</mosaic_0001>

<bundles_post_ra>
// kernel: tpu_custom_call.1
= control target key start
LH: loop header
LB: loop body
LE: loop exit
PB: predicated region body
PF: predicated region fallthrough
CT: control target
= control target key end

     0   :  { %9 = vsyncpa [#allocation5], 0  ;;  %s895_s0 = inlined_call_operand.hbm [shape: f32[2,4,256], index: 0, kind: input, shape index: {}]   ;;  %s896_s1 = inlined_call_operand.hbm [shape: s32[2,1,256], index: 1, kind: input, shape index: {}]   ;;  %s897_s2 = inlined_call_operand.vmem [shape: f32[2,4,1], index: 2, kind: output, shape index: {0}]   ;;  %s898_s3 = inlined_call_operand.vmem [shape: f32[2,4,1], index: 3, kind: output, shape index: {1}]  }
   0x1   :  { %11 = vsyncpa [#allocation5 + $0x1], 0 }
   0x2   :  { %12 = vsyncpa [#allocation7], 0 }
   0x3   :  { %14 = vsyncpa [#allocation7 + $0x1], 0  ;;  %s753_s12 = smov 0   ;;  %s755_s13 = smov 0  }
   0x4   :  { %s757_s14 = smov 0   ;;  %s759_s15 = smov 0  }
   0x5   :  { %s761_s16 = smov 0   ;;  %s763_s17 = smov 0  }
   0x6 LB: > { %s528_s18 = sadd.s32 4294967295, %s728_s17   ;;  %s32_s19 = sadd.s32 1, %s724_s16  ;;  %s728_s17 = sphi %s763_s17, %s20_s17   ;;  %s724_s16 = sphi %s761_s16, %s907_s16   ;;  %s720_s15 = sphi %s759_s15, %s906_s15   ;;  %s716_s14 = sphi %s757_s14, %s905_s14   ;;  %s712_s13 = sphi %s755_s13, %s904_s13   ;;  %s708_s12 = sphi %s753_s12, %s903_s12  }
   0x7   : > { %p34_p0 = scmp.ge.s32.totalorder %s32_s19, 2  ;;  %s41_s20 = sadd.s32 1, %s716_s14 }
   0x8   : > { %p48_p1 = scmp.ne.s32.totalorder %s716_s14, %s712_s13  ;;  %p49_p2 = scmp.eq.s32.totalorder %s728_s17, 0 }
   0x9   : > { %s909_s19 = smov (%p34_p0, %s32_s19), 0  ;;  %p54_p4 = scmp.ne.s32.totalorder %s712_s13, %s708_s12 }
   0xa   : > { %p789_p3 = por %p49_p2, %p48_p1  ;;  %s36_s22 = ssub.s32 %s724_s16, %s909_s19 }
   0xb   : > { %p55_p5 = scmp.eq.s32.totalorder %s528_s18, 0  ;;  %p39_p6 = scmp.eq.s32.totalorder %s36_s22, 0 }
   0xc   : > { %p561_p8 = scmp.lt.s32.totalorder %s728_s17, 2  ;;  %s805_s25 = sand.u32 1, %s716_s14  }
   0xd   : > { %p796_p7 = por %p55_p5, %p54_p4  ;;  %s548_s26 = sshll.u32 %s724_s16, 7 }
   0xe   : > { %s802_s24 = scalar_select %p39_p6, %s716_s14, %s41_s20  }
   0xf   : > { %s532_s27 = sshll.u32 %s805_s25, 3  ;;  %s170_s30 = scalar_lea.hbm %s895_s0, %s548_s26 }
  0x10   : > { %s162_s4 = scalar_lea.vmem [#allocation4], %s532_s27  ;;  %p814_p9 = pnand %p561_p8, %p789_p3 }
  0x11   : > { %s172_s5 = sshll.u32 %s162_s4, 4  ;;  %p538_p10 = scmp.ge.s32.totalorder %s728_s17, 1  ;;  %s173_s5 = int_to_ptr.vmem [resolvable:$true] %s172_s5 }
  0x12   : > { %p198_p11 = scmp.lt.s32.totalorder %s728_s17, 3  ;;  %s159_s7 = scalar_lea.sflag [#allocation5], %s805_s25 }
  0x13   : > { %p620_p12 = pneg %p814_p9  ;;  %s631_s8 = scalar_lea.vmem %s173_s5, 128 }
  0x14   : > { %p632_p13 = scmp.ne.s32.totalorder %s173_s5, %s631_s8  ;;  %s730_s9 = smov [#allocation4]  }
  0x15   : > { %s636_s10 = sshll.u32 %s730_s9, 4  ;;  %s637_s10 = int_to_ptr.vmem [resolvable:$false] %s636_s10 }
  0x16   : > { %p634_p0 = pnand %p632_p13, %p620_p12  ;;  %s638_s11 = scalar_lea.vmem %s637_s10, 256 }
  0x17   : > { %p639_p2 = scmp.lt.s32.totalorder %s173_s5, %s637_s10  ;;  %p640_p3 = scmp.lt.s32.totalorder %s638_s11, %s631_s8 }
  0x18   : > { %p635_p1 = pneg %p634_p0 }
  0x19   : > { %p641_p4 = por %p640_p3, %p639_p2 }
  0x1b   : > { %p642_p5 = pnand %p641_p4, %p635_p1 }
  0x1d   : > { %645 = shalt.err (!%p642_p5)
}
  0x1e   : > { %557 = dma.hbm_to_vmem [thread:$0]  (!%p814_p9), %s170_s30, 128, %s173_s5, %s159_s7  }
  0x1f   : > { %p832_p6 = pnand %p538_p10, %p198_p11  ;;  %s535_s18 = sshll.u32 %s805_s25, 1 }
  0x20   : > { %s549_s20 = sshll.u32 %s724_s16, 5  ;;  %s183_s27 = scalar_lea.vmem [#allocation6], %s535_s18 }
  0x21   : > { %s191_s26 = scalar_lea.hbm %s896_s1, %s549_s20  ;;  %s193_s28 = sshll.u32 %s183_s27, 4  ;;  %s194_s28 = int_to_ptr.vmem [resolvable:$true] %s193_s28 }
  0x22   : > { %s180_s29 = scalar_lea.sflag [#allocation7], %s805_s25  ;;  %s659_s4 = scalar_lea.vmem %s194_s28, 32 }
  0x23   : > { %p660_p8 = scmp.ne.s32.totalorder %s194_s28, %s659_s4  ;;  %s731_s30 = smov [#allocation6]  }
  0x24   : > { %s664_s5 = sshll.u32 %s731_s30, 4  ;;  %s665_s5 = int_to_ptr.vmem [resolvable:$false] %s664_s5 }
  0x25   : > { %p662_p13 = pnand %p660_p8, %p620_p12  ;;  %s666_s7 = scalar_lea.vmem %s665_s5, 64 }
  0x26   : > { %p667_p10 = scmp.lt.s32.totalorder %s194_s28, %s665_s5  ;;  %p668_p11 = scmp.lt.s32.totalorder %s666_s7, %s659_s4 }
  0x27   : > { %p663_p0 = pneg %p662_p13 }
  0x28   : > { %p669_p1 = por %p668_p11, %p667_p10 }
  0x2a   : > { %p670_p2 = pnand %p669_p1, %p663_p0 }
  0x2c   : > { %673 = shalt.err (!%p670_p2)
}
  0x2d   : > { %560 = dma.hbm_to_vmem [thread:$0]  (!%p814_p9), %s191_s26, 32, %s194_s28, %s180_s29  }
  0x2e   : > { %202 = sbr.rel (%p832_p6) target bundleno = 276 (0x114), region = 28  ;;  %s204_s25 = sand.u32 (!%p832_p6), 1, %s712_s13  }
  0x2f   : > { %s539_s8 = sshll.u32 (!%p832_p6), %s204_s25, 3  ;;  %s205_s9 = scalar_lea.sflag (!%p832_p6), [#allocation5], %s204_s25 }
  0x30   : > { %s208_s10 = scalar_lea.vmem (!%p832_p6), [#allocation4], %s539_s8 }
  0x33   : > { %699 = dma.done.wait (%p796_p7), %s205_s9, 128  }
  0x34   : > { %701 = vsyncadd (%p796_p7), %s205_s9, 4294967168  ;;  %s540_s11 = sshll.u32 %s204_s25, 1  ;;  %s214_s18 = scalar_lea.sflag [#allocation7], %s204_s25 }
  0x35   : > { %s854_s20 = scalar_lea.vmem [#allocation6], %s540_s11 }
  0x36   : > { %703 = dma.done.wait (%p796_p7), %s214_s18, 32  }
  0x37   : > { %705 = vsyncadd (%p796_p7), %s214_s18, 4294967264  ;;  %vm270_vm0 = vcmask 1043456   ;;  %v264_v0 = vld [vmem:[%s208_s10] sm:$0xff]  ;;  %v265_v28 = vld [vmem:[%s854_s20] sm:$0x3]  ;;  %v318_v33 = vlaneseq  ;;  %v732_v44 = vmov 0.0  }
  0x38   : > { %v268_v1 = vcombine.high %v264_v0, %v264_v0  ;;  %v271_v2 = vsel %vm270_vm0, %v264_v0, -inf  ;;  %vm320_vm1 = vcmp.gt.s32.totalorder %v265_v28, 0  ;;  %vm266_vm3 = vcmp.ne.s32.totalorder %v265_v28, 255  ;;  %p250_p7 = scmp.lt.s32.totalorder %s720_s15, 1 }
  0x39   : > { %v272_v3 = vrot.slane %v271_v2, 4  ;;  %v321_v36 = vsel %vm320_vm1, %v265_v28, 0  ;;  %v319_v38 = vshrl.u32 %v318_v33, 7  ;;  %v543_v45 = vsel %vm266_vm3, 1.0, %v732_v44 }
  0x3a   : > { %v278_v4 = vsel %vm270_vm0, %v268_v1, -inf  ;;  %vm322_vm2 = vcmp.lt.s32.totalorder %v321_v36, 3  ;;  %s911_s15 = smov (!%p250_p7, %s720_s15), 1  ;;  %vm383_vm6 = vcmask 3072  }
  0x3b   : > { %v273_v5 = vmax.f32 %v271_v2, %v272_v3  ;;  %v279_v6 = vrot.slane %v278_v4, 4  ;;  %v326_v39 = vsub.s32 0, %v319_v38  ;;  %v330_v40 = vsub.s32 1, %v319_v38  ;;  %s541_s23 = sshll.u32 %s911_s15, 2 }
  0x3c   : > { %v323_v41 = vsel %vm322_vm2, %v321_v36, 3  ;;  %s253_s21 = scalar_lea.vmem %s897_s2, %s541_s23  ;;  %s257_s27 = scalar_lea.vmem %s898_s3, %s541_s23 }
  0x3d   : > { %v274_v7 = vrot.slane %v273_v5, 2  ;;  %v280_v8 = vmax.f32 %v278_v4, %v279_v6  ;;  %v327_v42 = vrot.slane %v323_v41, %v326_v39  ;;  %v331_v43 = vrot.slane %v323_v41, %v330_v40 }
  0x3e   : > { %v342_v46 = vrot.slane %v543_v45, %v326_v39  ;;  %v346_v47 = vrot.slane %v543_v45, %v330_v40 }
  0x3f   : > { %v275_v9 = vmax.f32 %v273_v5, %v274_v7  ;;  %v281_v10 = vrot.slane %v280_v8, 2  ;;  %vm332_vm4 = vcmp.eq.s32.totalorder %v319_v38, %v327_v42  ;;  %vm333_vm5 = vcmp.eq.s32.totalorder %v319_v38, %v331_v43 }
  0x40   : > { %v544_v50 = vsel %vm332_vm4, 1.0, %v732_v44  ;;  %v545_v51 = vsel %vm333_vm5, 1.0, %v732_v44  ;;  %v349_v53 = vcombine.low %v342_v46, %v346_v47 }
  0x41   : > { %v276_v11 = vrot.slane %v275_v9, 1  ;;  %v282_v12 = vmax.f32 %v280_v8, %v281_v10  ;;  %v362_v54 = vmul.f32 %v544_v50, %v342_v46  ;;  %v363_v55 = vmul.f32 %v545_v51, %v346_v47 }
  0x42   : > { %v355_v57 = vcombine.low %v544_v50, %v545_v51 }
  0x43   : > { %v277_v13 = vmax.f32 %v275_v9, %v276_v11  ;;  %v283_v14 = vrot.slane %v282_v12, 1  ;;  %v366_v59 = vcombine.low %v362_v54, %v363_v55 }
  0x45   : > { %v284_v15 = vmax.f32 %v282_v12, %v283_v14 }
  0x47   : > { %v287_v16 = vcombine.low %v277_v13, %v284_v15 }
  0x49   : > { %v289_v17 = vsub.f32 %v264_v0, %v287_v16 }
  0x4b   : > { %v290_v18 = vmul.f32 1.442695, %v289_v17 }
  0x4d   : > { %612 = vpow2.f32 %v290_v18 }
  0x5a   : > { %v613_v19 = vpop.eup %612 }
  0x5b   : > { %v293_v20 = vcombine.high %v613_v19, %v613_v19  ;;  %v295_v21 = vsel %vm270_vm0, %v613_v19, 0.0 }
  0x5c   : > { %v296_v22 = vrot.slane %v295_v21, 4 }
  0x5d   : > { %v302_v23 = vsel %vm270_vm0, %v293_v20, 0.0 }
  0x5e   : > { %v297_v24 = vadd.f32 %v296_v22, %v295_v21  ;;  %v303_v25 = vrot.slane %v302_v23, 4 }
  0x60   : > { %v298_v26 = vrot.slane %v297_v24, 2  ;;  %v304_v27 = vadd.f32 %v303_v25, %v302_v23 }
  0x62   : > { %v299_v29 = vadd.f32 %v298_v26, %v297_v24  ;;  %v305_v30 = vrot.slane %v304_v27, 2 }
  0x64   : > { %v300_v31 = vrot.slane %v299_v29, 1  ;;  %v306_v32 = vadd.f32 %v305_v30, %v304_v27 }
  0x66   : > { %v301_v34 = vadd.f32 %v300_v31, %v299_v29  ;;  %v307_v35 = vrot.slane %v306_v32, 1 }
  0x68   : > { %v308_v37 = vadd.f32 %v307_v35, %v306_v32  ;;  %614 = vrcp.f32 %v301_v34 }
  0x6a   : > { %616 = vrcp.f32 %v308_v37 }
  0x75   : > { %v615_v48 = vpop.eup %614 }
  0x77   : > { %v617_v49 = vpop.eup %616 }
  0x78   : > { %v313_v52 = vcombine.low %v615_v48, %v617_v49 }
  0x7a   : > { %v315_v56 = vmul.f32 %v613_v19, %v313_v52 }
  0x7c   : > { %v351_v58 = vmul.f32 %v349_v53, %v315_v56 }
  0x7e   : > { %v357_v60 = vmul.f32 %v355_v57, %v351_v58  ;;  %v361_v61 = vmul.f32 %v351_v58, %v315_v56 }
  0x80   : > { %v376_v62 = vcombine.high %v357_v60, %v357_v60  ;;  %v378_v63 = vsel %vm270_vm0, %v357_v60, 0.0  ;;  %v368_v0 = vadd.f32 %v366_v59, %v361_v61 }
  0x82   : > { %v379_v1 = vsel %vm270_vm0, %v376_v62, 0.0  ;;  %v387_v2 = vcombine.high %v368_v0, %v368_v0  ;;  %v389_v3 = vsel %vm270_vm0, %v368_v0, 0.0 }
  0x83   : > { %v380_v4 = vadd.f32 %v379_v1, %v378_v63 }
  0x84   : > { %v390_v5 = vsel %vm270_vm0, %v387_v2, 0.0 }
  0x85   : > { %381 = vadd.xlane.f32.xlu0 %v380_v4  ;;  %v391_v6 = vadd.f32 %v390_v5, %v389_v3 }
  0x89   : > { %392 = vadd.xlane.f32.xlu0 %v391_v6 }
 0x10e   : > { %v382_v7 = vpop.xlane.xlu0 %381 }
 0x10f   : > { %384 = vst.msk [vmem:[%s253_s21] sm:$0xf] %vm383_vm6, %v382_v7 }
 0x112   : > { %v393_v8 = vpop.xlane.xlu0 %392 }
 0x113   : > { %394 = vst.msk [vmem:[%s257_s27] sm:$0xf] %vm383_vm6, %v393_v8 }
 0x114 PF: > { %s20_s17 = sadd.s32 1, %s728_s17   ;;  %s903_s12 = smov %s712_s13 }
 0x115   : > { %p17_p9 = scmp.ge.s32.totalorder %s20_s17, 4   ;;  %s904_s13 = smov %s716_s14 }
 0x116   : > { %s905_s14 = smov %s802_s24  ;;  %s906_s15 = smov %s724_s16 }
 0x117   : > { %s907_s16 = smov %s909_s19  ;;  %19 = sbr.rel (!%p17_p9) target bundleno = 6 (0x6), region = 101 }
 0x11c   :  { %428 = vsyncpa [#allocation5], 1 }
 0x11d   :  { %430 = vsyncpa [#allocation5 + $0x1], 1 }
 0x11e   :  { %431 = vsyncpa [#allocation7], 1 }
 0x11f   :  { %433 = vsyncpa [#allocation7 + $0x1], 1 }

</bundles_post_ra>
